<compile_context>
chip_gen: v5e
topology: v5e:2x2
jax: 0.10.0
libtpu: 0.0.40
codegen_flags: <defaults>
</compile_context>

<pallas_src>
import functools

import jax
import jax.numpy as jnp
from jax import lax
from jax.experimental import pallas as pl
from jax.experimental.pallas import tpu as pltpu

N_EMBD = 384        # fixed by the module
BLOCK_SIZE = 256    # tril buffer size (T must be <= BLOCK_SIZE)


def _head_kernel(x_ref, w_ref, o_ref, *, head_size):
    Bt, T, C = x_ref.shape
    H = head_size

    # Fused q/k/v projection: one (Bt*T, C) @ (C, 3H) matmul (leading-dim merge only,
    # so the reshape is layout-free). Contract the lane (C) dims of both operands.
    x2 = x_ref[...].reshape(Bt * T, C)
    qkv = lax.dot_general(
        x2, w_ref[...],
        dimension_numbers=(((1,), (1,)), ((), ())),          # contract C with C
        preferred_element_type=jnp.float32,
    ).reshape(Bt, T, 3 * H)                                    # leading-dim split only

    q = qkv[:, :, :H]            # scale already folded into W_query in the wrapper
    k = qkv[:, :, H:2 * H]
    v = qkv[:, :, 2 * H:]

    # Attention scores (Bt, T_q, T_k): batched dot contracting the lane (H) dims.
    wei = lax.dot_general(
        q, k,
        dimension_numbers=(((2,), (2,)), ((0,), (0,))),
        preferred_element_type=jnp.float32,
    )

    # Causal mask: tril[:T,:T] == 0  <=>  col(j) > row(i)  ->  -inf.
    row = lax.broadcasted_iota(jnp.int32, (T, 1), 0)          # query index i
    col = lax.broadcasted_iota(jnp.int32, (1, T), 1)          # key index j
    wei = jnp.where((col > row)[None, :, :], -jnp.inf, wei)

    # softmax over dim=1 of (B, T, T) == the *query* axis, exactly as the reference.
    m = jnp.max(wei, axis=1, keepdims=True)
    e = jnp.exp(wei - m)
    denom = jnp.sum(e, axis=1, keepdims=True)
    p = e / denom      # exact reciprocal: stays within 1e-4 of the f32 reference

    # dropout: eval-mode identity

    out = lax.dot_general(
        p, v,
        dimension_numbers=(((2,), (1,)), ((0,), (0,))),
        preferred_element_type=jnp.float32,
    )                                                          # (Bt, T, H)
    o_ref[...] = out.astype(o_ref.dtype)


def _pick_block_b(B):
    # Amortize per-grid-step overhead, but:
    #  * cap at 8 so T=256 tiles stay safely inside scoped VMEM on every chip
    #  * keep >= 2 grid steps when possible so v7x's 2 TensorCores both get work
    target = max(1, min(8, B // 2))
    for bb in range(target, 0, -1):
        if B % bb == 0:
            return bb
    return 1


def head_forward(x, w_key, w_query, w_value, *, block_b=None):
    """x: (B, T, C) f32; weights: (H, C) f32. Returns (B, T, H) f32."""
    B, T, C = x.shape
    H = w_key.shape[0]
    assert C == N_EMBD and T <= BLOCK_SIZE
    scale = float(C) ** -0.5

    if block_b is None:
        block_b = _pick_block_b(B)
    assert B % block_b == 0

    # Fuse the three projection weights into a single (3H, C) matrix (q | k | v order);
    # fold the attention scale into the query weight (tiny one-time XLA op).
    w_qkv = jnp.concatenate([w_query * scale, w_key, w_value], axis=0)

    kernel = functools.partial(_head_kernel, head_size=H)

    return pl.pallas_call(
        kernel,
        out_shape=jax.ShapeDtypeStruct((B, T, H), x.dtype),
        grid_spec=pltpu.PrefetchScalarGridSpec(
            num_scalar_prefetch=0,
            grid=(B // block_b,),
            in_specs=[
                pl.BlockSpec((block_b, T, C), lambda b: (b, 0, 0)),   # x tile
                pl.BlockSpec((3 * H, C), lambda b: (0, 0)),           # fused W_qkv
            ],
            out_specs=pl.BlockSpec((block_b, T, H), lambda b: (b, 0, 0)),
        ),
        compiler_params=pltpu.CompilerParams(
            dimension_semantics=("parallel",),
            vmem_limit_bytes=32 * 1024 * 1024,   # headroom for the T=256 worst case
        ),
    )(x, w_qkv)


def head_forward_ref(x, w_key, w_query, w_value):
    """Pure-JAX reference reproducing the PyTorch forward (eval mode)."""
    B, T, C = x.shape
    k = x @ w_key.T
    q = x @ w_query.T
    wei = (q @ jnp.swapaxes(k, -2, -1)) * (C ** -0.5)
    mask = jnp.tril(jnp.ones((T, T), dtype=bool))
    wei = jnp.where(mask[None, :, :], wei, -jnp.inf)
    wei = jax.nn.softmax(wei, axis=1)      # dim=1, exactly as the reference
    v = x @ w_value.T
    return wei @ v


if __name__ == "__main__":
    B, T, C = 2, 16, N_EMBD
    head_size = 64

    key = jax.random.PRNGKey(0)
    kx, kk, kq, kv = jax.random.split(key, 4)

    x = jax.random.normal(kx, (B, T, C), dtype=jnp.float32)
    # nn.Linear default init: U(-1/sqrt(fan_in), 1/sqrt(fan_in))
    bound = 1.0 / (C ** 0.5)
    w_key = jax.random.uniform(kk, (head_size, C), jnp.float32, -bound, bound)
    w_query = jax.random.uniform(kq, (head_size, C), jnp.float32, -bound, bound)
    w_value = jax.random.uniform(kv, (head_size, C), jnp.float32, -bound, bound)

    out = head_forward(x, w_key, w_query, w_value)
    out = jax.block_until_ready(out)

    ref = head_forward_ref(x, w_key, w_query, w_value)
    if not jnp.allclose(out, ref, atol=1e-4, rtol=1e-4):
        raise AssertionError("Pallas kernel output mismatch vs JAX reference")

    print("KERNEL_OK")
</pallas_src>

<mosaic_0001>
module attributes {stable_mosaic.version = 11 : i64} {
  func.func @_head_kernel(%arg0: i32, %arg1: memref<1x16x384xf32, #tpu.memory_space<vmem>>, %arg2: memref<192x384xf32, #tpu.memory_space<vmem>>, %arg3: memref<1x16x64xf32, #tpu.memory_space<vmem>>) attributes {dimension_semantics = [#tpu.dimension_semantics<parallel>], iteration_bounds = array<i64: 2>, scalar_prefetch = 0 : i64, scratch_operands = 0 : i64, tpu.core_type = #tpu.core_type<tc>, window_params = [{transform_indices = @transform_0, window_bounds = array<i64: 1, 16, 384>}, {pipeline_mode = #tpu.pipeline_mode<synchronous>, transform_indices = @transform_1, window_bounds = array<i64: 192, 384>}, {transform_indices = @transform_2, window_bounds = array<i64: 1, 16, 64>}]} {
    %c0 = arith.constant 0 : index
    %c0_0 = arith.constant 0 : index
    %c0_1 = arith.constant 0 : index
    %0 = vector.load %arg1[%c0, %c0_0, %c0_1] : memref<1x16x384xf32, #tpu.memory_space<vmem>>, vector<1x16x384xf32>
    %1 = vector.shape_cast %0 : vector<1x16x384xf32> to vector<16x384xf32>
    %c0_2 = arith.constant 0 : index
    %c0_3 = arith.constant 0 : index
    %2 = vector.load %arg2[%c0_2, %c0_3] : memref<192x384xf32, #tpu.memory_space<vmem>>, vector<192x384xf32>
    %cst = arith.constant dense<0.000000e+00> : vector<16x192xf32>
    %3 = tpu.matmul %1, %2, %cst {dimension_numbers = #tpu.dot_dimension_numbers<[1], [1], [0], [0], [0, 0, 1, 0], [], []>} : vector<16x384xf32>, vector<192x384xf32>, vector<16x192xf32> -> vector<16x192xf32>
    %4 = vector.shape_cast %3 : vector<16x192xf32> to vector<1x16x192xf32>
    %5 = vector.extract_strided_slice %4 {offsets = [0, 0, 0], sizes = [1, 16, 64], strides = [1, 1, 1]} : vector<1x16x192xf32> to vector<1x16x64xf32>
    %6 = vector.extract_strided_slice %4 {offsets = [0, 0, 64], sizes = [1, 16, 64], strides = [1, 1, 1]} : vector<1x16x192xf32> to vector<1x16x64xf32>
    %7 = vector.extract_strided_slice %4 {offsets = [0, 0, 128], sizes = [1, 16, 64], strides = [1, 1, 1]} : vector<1x16x192xf32> to vector<1x16x64xf32>
    %cst_4 = arith.constant dense<0.000000e+00> : vector<1x16x16xf32>
    %8 = tpu.matmul %5, %6, %cst_4 {dimension_numbers = #tpu.dot_dimension_numbers<[2], [2], [1], [1], [0, 0, 0, 1, 1, 1], [0], [0]>} : vector<1x16x64xf32>, vector<1x16x64xf32>, vector<1x16x16xf32> -> vector<1x16x16xf32>
    %9 = tpu.iota {dimensions = array<i32: 0>} : vector<16x1xi32>
    %10 = tpu.iota {dimensions = array<i32: 1>} : vector<1x16xi32>
    %11 = vector.broadcast %10 : vector<1x16xi32> to vector<16x16xi32>
    %12 = vector.broadcast %9 : vector<16x1xi32> to vector<16x16xi32>
    %13 = arith.cmpi sgt, %11, %12 : vector<16x16xi32>
    %14 = vector.shape_cast %13 : vector<16x16xi1> to vector<1x16x16xi1>
    %cst_5 = arith.constant 0xFF800000 : f32
    %15 = vector.broadcast %cst_5 : f32 to vector<1x16x16xf32>
    %16 = arith.select %14, %15, %8 : vector<1x16x16xi1>, vector<1x16x16xf32>
    %cst_6 = arith.constant dense<0xFF800000> : vector<1x16xf32>
    %17 = vector.multi_reduction <maximumf>, %16, %cst_6 [1] : vector<1x16x16xf32> to vector<1x16xf32>
    %18 = vector.shape_cast %17 : vector<1x16xf32> to vector<1x1x16xf32>
    %19 = vector.broadcast %18 : vector<1x1x16xf32> to vector<1x16x16xf32>
    %20 = arith.subf %16, %19 : vector<1x16x16xf32>
    %21 = math.exp %20 : vector<1x16x16xf32>
    %cst_7 = arith.constant dense<0.000000e+00> : vector<1x16xf32>
    %22 = vector.multi_reduction <add>, %21, %cst_7 [1] : vector<1x16x16xf32> to vector<1x16xf32>
    %23 = vector.shape_cast %22 : vector<1x16xf32> to vector<1x1x16xf32>
    %24 = vector.broadcast %23 : vector<1x1x16xf32> to vector<1x16x16xf32>
    %25 = arith.divf %21, %24 : vector<1x16x16xf32>
    %cst_8 = arith.constant dense<0.000000e+00> : vector<1x16x64xf32>
    %26 = tpu.matmul %25, %7, %cst_8 {dimension_numbers = #tpu.dot_dimension_numbers<[2], [1], [1], [2], [0, 0, 0, 1, 1, 2], [0], [0]>} : vector<1x16x16xf32>, vector<1x16x64xf32>, vector<1x16x64xf32> -> vector<1x16x64xf32>
    %c0_9 = arith.constant 0 : index
    %c0_10 = arith.constant 0 : index
    %c0_11 = arith.constant 0 : index
    %27 = vector.load %arg3[%c0_9, %c0_10, %c0_11] : memref<1x16x64xf32, #tpu.memory_space<vmem>>, vector<1x16x64xf32>
    tpu.vector_store %arg3[%c0_9, %c0_10, %c0_11], %26 {strides = array<i32>} : memref<1x16x64xf32, #tpu.memory_space<vmem>>, vector<1x16x64xf32>,
    return
  }
  func.func @transform_0(%arg0: i32) -> (i32, i32, i32) {
    %c0_i32 = arith.constant 0 : i32
    %c0_i32_0 = arith.constant 0 : i32
    %c0_i32_1 = arith.constant 0 : i32
    return %arg0, %c0_i32, %c0_i32_0 : i32, i32, i32
  }
  func.func @transform_1(%arg0: i32) -> (i32, i32) {
    %c0_i32 = arith.constant 0 : i32
    %c0_i32_0 = arith.constant 0 : i32
    %c0_i32_1 = arith.constant 0 : i32
    return %c0_i32, %c0_i32_0 : i32, i32
  }
  func.func @transform_2(%arg0: i32) -> (i32, i32, i32) {
    %c0_i32 = arith.constant 0 : i32
    %c0_i32_0 = arith.constant 0 : i32
    %c0_i32_1 = arith.constant 0 : i32
    return %arg0, %c0_i32, %c0_i32_0 : i32, i32, i32
  }
}

</mosaic_0001>

<bundles_post_ra>
// kernel: tpu_custom_call.1
= control target key start
LH: loop header
LB: loop body
LE: loop exit
PB: predicated region body
PF: predicated region fallthrough
CT: control target
= control target key end

     0   :  { %7 = vsyncpa [#allocation3], 0  ;;  %s1040_s0 = inlined_call_operand.hbm [shape: f32[2,16,384], index: 0, kind: input, shape index: {}]   ;;  %s1041_s1 = inlined_call_operand.hbm [shape: f32[192,384], index: 1, kind: input, shape index: {}]   ;;  %s1042_s2 = inlined_call_operand.hbm [shape: f32[2,16,64], index: 2, kind: output, shape index: {}]  }
   0x1   :  { %9 = vsyncpa [#allocation3 + $0x1], 0 }
   0x2   :  { %10 = vsyncpa [#allocation6], 0 }
   0x3   :  { %11 = vsyncpa [#allocation4], 0 }
   0x4   :  { %13 = vsyncpa [#allocation4 + $0x1], 0  ;;  %s867_s9 = smov 0   ;;  %s869_s10 = smov 0  }
   0x5   :  { %s871_s11 = smov 0   ;;  %s873_s12 = smov 0  }
   0x6 LB: > { %s888_s13 = sadd.s32 4294967295, %s844_s12   ;;  %s615_s14 = sadd.s32 4294967294, %s844_s12   ;;  %s844_s12 = sphi %s873_s12, %s1052_s12   ;;  %s840_s11 = sphi %s871_s11, %s1051_s11   ;;  %s836_s10 = sphi %s869_s10, %s1050_s10   ;;  %s832_s9 = sphi %s867_s9, %s1049_s9  }
   0x7   : > { %p39_p0 = scmp.ne.s32.totalorder %s836_s10, %s832_s9  ;;  %p40_p1 = scmp.eq.s32.totalorder %s888_s13, 0 }
   0x8   : > { %p84_p2 = scmp.eq.s32.totalorder %s888_s13, 1  ;;  %p90_p3 = scmp.eq.s32.totalorder %s615_s14, 1 }
   0x9   : > { %p897_p4 = por %p40_p1, %p39_p0  ;;  %p616_p5 = scmp.ge.s32.totalorder %s844_s12, 1 }
   0xa   : > { %p902_p6 = por %p90_p3, %p39_p0  ;;  %p97_p7 = scmp.lt.s32.totalorder %s844_s12, 3 }
   0xb   : > { %s108_s19 = sshll.u32 %s1041_s1, 4  ;;  %s846_s21 = smov [#allocation5]   ;;  %s109_s19 = int_to_ptr.hbm [resolvable:$true] %s108_s19 }
   0xc   : > { %p910_p8 = pnand %p616_p5, %p97_p7  ;;  %s110_s22 = sshll.u32 %s846_s21, 4  ;;  %s111_s22 = int_to_ptr.vmem [resolvable:$true] %s110_s22 }
   0xd   : > { %s920_s23 = sadd.s32 1, %s844_s12   ;;  %s847_s24 = smov 384  }
   0xe   : > { %p654_p9 = pneg %p910_p8  ;;  %s848_s25 = smov 24  }
   0xf   : > { %s23_s26 = ssub.s32 %s844_s12, %s920_s23  ;;  %s26_s27 = sadd.s32 1, %s840_s11 }
  0x10   : > { %p655_p10 = pnand %p654_p9, %p40_p1  ;;  %p24_p12 = scmp.eq.s32.totalorder %s23_s26, 0 }
  0x11   : > { %p33_p13 = scmp.ne.s32.totalorder %s840_s11, %s836_s10  ;;  %p34_p0 = scmp.eq.s32.totalorder %s844_s12, 0 }
  0x12   : > { %657 = dma.hbm_to_vmem [thread:$0]  (!%p655_p10), %s109_s19, 9216, %s111_s22, [#allocation6], %s847_s24, %s847_s24, %s848_s25  }
  0x13   : > { %p667_p3 = scmp.lt.s32.totalorder %s844_s12, 2  ;;  %p35_p5 = por %p34_p0, %p33_p13 }
  0x14   : > { %s933_s28 = scalar_select %p24_p12, %s840_s11, %s26_s27  }
  0x15   : > { %p937_p7 = por %p84_p2, %p33_p13  ;;  %s124_s30 = sand.u32 1, %s840_s11  }
  0x16   : > { %s644_s3 = smul.u32 48, %s844_s12  ;;  %p946_p9 = pnand %p667_p3, %p35_p5 }
  0x17   : > { %s643_s4 = smul.u32 48, %s124_s30  ;;  %s125_s19 = scalar_lea.sflag [#allocation3], %s124_s30 }
  0x18   : > { %s133_s7 = scalar_lea.hbm %s1040_s0, %s644_s3  ;;  %p748_p10 = pneg %p946_p9 }
  0x19   : > { %s134_s14 = sshll.u32 %s133_s7, 4  ;;  %s128_s17 = scalar_lea.vmem [#allocation2], %s643_s4  ;;  %s135_s14 = int_to_ptr.hbm [resolvable:$true] %s134_s14 }
  0x1a   : > { %s136_s18 = sshll.u32 %s128_s17, 4  ;;  %s744_s21 = sshra.s32 %s135_s14, 4  ;;  %s137_s18 = int_to_ptr.vmem [resolvable:$true] %s136_s18  ;;  %s745_s21 = int_to_ptr.hbm [resolvable:$true] %s744_s21 }
  0x1b   : > { %s746_s22 = scalar_lea.hbm %s745_s21, 48  ;;  %s751_s3 = scalar_lea.hbm %s1040_s0, 96 }
  0x1c   : > { %p747_p2 = scmp.ne.s32.totalorder %s745_s21, %s746_s22  ;;  %p752_p0 = scmp.lt.s32.totalorder %s745_s21, %s1040_s0 }
  0x1d   : > { %p753_p3 = scmp.lt.s32.totalorder %s751_s3, %s746_s22 }
  0x1e   : > { %p749_p12 = pnand %p748_p10, %p747_p2 }
  0x1f   : > { %p754_p5 = por %p753_p3, %p752_p0 }
  0x20   : > { %p750_p13 = pneg %p749_p12 }
  0x22   : > { %p755_p11 = pnand %p754_p5, %p750_p13 }
  0x24   : > { %758 = shalt.err (!%p755_p11)
}
  0x25   : > { %661 = dma.hbm_to_vmem [thread:$0]  (!%p946_p9), %s135_s14, 768, %s137_s18, %s125_s19, %s847_s24, %s847_s24, %s848_s25  }
  0x26   : > { %148 = sbr.rel (%p910_p8) target bundleno = 718 (0x2ce), region = 28  ;;  %s966_s30 = sand.u32 (!%p910_p8), 1, %s836_s10  }
  0x27   : > { %s645_s4 = smul.u32 (!%p910_p8), 48, %s966_s30  ;;  %s151_s7 = scalar_lea.sflag (!%p910_p8), [#allocation3], %s966_s30 }
  0x29   : > { %s970_s17 = scalar_lea.vmem (!%p910_p8), [#allocation2], %s645_s4 }
  0x2b   : > { %819 = dma.done.wait (%p897_p4), %s151_s7, 768  }
  0x2c   : > { %821 = vsyncadd (%p897_p4), %s151_s7, 4294966528 }
  0x2d   : > { %823 = dma.done.wait (%p40_p1), [#allocation6], 9216  }
  0x2e   : > { %825 = vsyncadd (%p40_p1), [#allocation6], 4294958080  ;;  %v234_v0 = vld [vmem:[#allocation5 + $0x178] sm:$0xff]  ;;  %v232_v1 = vld [vmem:[#allocation5 + $0x168] sm:$0xff]  ;;  %s849_s15 = smov 64   ;;  %vm403_vm0 = vcmask 523264  }
  0x2f   : > { %v233_v2 = vld [vmem:[#allocation5 + $0x170] sm:$0xff]  ;;  %305 = vmatpush.xpose.msra.mxu2 %v234_v0  ;;  %259 = vmatpush.xpose.msra.mxu0 %v232_v1  ;;  %v231_v3 = vld [vmem:[#allocation5 + $0x160] sm:$0xff]  ;;  %v230_v5 = vld [vmem:[#allocation5 + $0x158] sm:$0xff]  ;;  %vm444_vm3 = vcmask 130048   ;;  %s622_s20 = sshll.u32 %s966_s30, 4  ;;  %s634_s24 = sshll.u32 %s888_s13, 4 }
  0x30   : > { %282 = vmatpush.xpose.msra.mxu1 %v233_v2  ;;  %v229_v4 = vld [vmem:[#allocation5 + $0x150] sm:$0xff]  ;;  %v228_v6 = vld [vmem:[#allocation5 + $0x148] sm:$0xff]  ;;  %v226_v7 = vld [vmem:[#allocation5 + $0x138] sm:$0xff]  ;;  %s528_s14 = scalar_lea.hbm %s1042_s2, %s634_s24  ;;  %s180_s18 = scalar_lea.vmem [#allocation7], %s622_s20 }
  0x31   : > { %v227_v8 = vld [vmem:[#allocation5 + $0x140] sm:$0xff]  ;;  %v225_v9 = vld [vmem:[#allocation5 + $0x130] sm:$0xff]  ;;  %v224_v11 = vld [vmem:[#allocation5 + $0x128] sm:$0xff]  ;;  %s529_s19 = sshll.u32 %s180_s18, 4  ;;  %s531_s21 = sshll.u32 %s528_s14, 4  ;;  %s530_s19 = int_to_ptr.vmem [resolvable:$true] %s529_s19  ;;  %s532_s21 = int_to_ptr.hbm [resolvable:$true] %s531_s21 }
  0x32   : > { %v223_v10 = vld [vmem:[#allocation5 + $0x120] sm:$0xff]  ;;  %v222_v12 = vld [vmem:[#allocation5 + $0x118] sm:$0xff]  ;;  %v220_v13 = vld [vmem:[#allocation5 + $0x108] sm:$0xff]  ;;  %s517_s22 = scalar_lea.sflag [#allocation4], %s966_s30  ;;  %s788_s26 = sshra.s32 %s532_s21, 4  ;;  %s789_s26 = int_to_ptr.hbm [resolvable:$true] %s788_s26 }
  0x33   : > { %306 = vmatpush.xpose.msra.mxu2 %v231_v3  ;;  %260 = vmatpush.xpose.msra.mxu0 %v229_v4  ;;  %v221_v14 = vld [vmem:[#allocation5 + $0x110] sm:$0xff]  ;;  %v219_v15 = vld [vmem:[#allocation5 + $0x100] sm:$0xff]  ;;  %v218_v17 = vld [vmem:[#allocation5 + $0xf8] sm:$0xff]  ;;  %s790_s13 = scalar_lea.hbm %s789_s26, 16  ;;  %s794_s5 = scalar_lea.hbm %s1042_s2, 32 }
  0x34   : > { %283 = vmatpush.xpose.msra.mxu1 %v230_v5  ;;  %v217_v16 = vld [vmem:[#allocation5 + $0xf0] sm:$0xff]  ;;  %v216_v18 = vld [vmem:[#allocation5 + $0xe8] sm:$0xff]  ;;  %v214_v19 = vld [vmem:[#allocation5 + $0xd8] sm:$0xff]  ;;  %p791_p1 = scmp.ne.s32.totalorder %s789_s26, %s790_s13  ;;  %p795_p11 = scmp.lt.s32.totalorder %s789_s26, %s1042_s2 }
  0x35   : > { %v215_v20 = vld [vmem:[#allocation5 + $0xe0] sm:$0xff]  ;;  %v213_v21 = vld [vmem:[#allocation5 + $0xd0] sm:$0xff]  ;;  %v212_v23 = vld [vmem:[#allocation5 + $0xc8] sm:$0xff]  ;;  %p796_p9 = scmp.lt.s32.totalorder %s794_s5, %s790_s13 }
  0x36   : > { %v211_v22 = vld [vmem:[#allocation5 + $0xc0] sm:$0xff]  ;;  %v210_v24 = vld [vmem:[#allocation5 + $0xb8] sm:$0xff]  ;;  %v208_v25 = vld [vmem:[#allocation5 + $0xa8] sm:$0xff]  ;;  %p792_p4 = pnand %p791_p1, %p937_p7 }
  0x37   : > { %307 = vmatpush.xpose.msra.mxu2 %v228_v6  ;;  %261 = vmatpush.xpose.msra.mxu0 %v226_v7  ;;  %v209_v26 = vld [vmem:[#allocation5 + $0xb0] sm:$0xff]  ;;  %v207_v27 = vld [vmem:[#allocation5 + $0xa0] sm:$0xff]  ;;  %v206_v29 = vld [vmem:[#allocation5 + $0x98] sm:$0xff]  ;;  %p797_p2 = por %p796_p9, %p795_p11 }
  0x38   : > { %284 = vmatpush.xpose.msra.mxu1 %v227_v8  ;;  %v205_v28 = vld [vmem:[#allocation5 + $0x90] sm:$0xff]  ;;  %v204_v30 = vld [vmem:[#allocation5 + $0x88] sm:$0xff]  ;;  %v202_v31 = vld [vmem:[#allocation5 + $0x78] sm:$0xff]  ;;  %p793_p8 = pneg %p792_p4 }
  0x39   : > { %v203_v32 = vld [vmem:[#allocation5 + $0x80] sm:$0xff]  ;;  %v201_v33 = vld [vmem:[#allocation5 + $0x70] sm:$0xff]  ;;  %v200_v35 = vld [vmem:[#allocation5 + $0x68] sm:$0xff] }
  0x3a   : > { %v199_v34 = vld [vmem:[#allocation5 + $0x60] sm:$0xff]  ;;  %v198_v36 = vld [vmem:[#allocation5 + $0x58] sm:$0xff]  ;;  %v196_v37 = vld [vmem:[#allocation5 + $0x48] sm:$0xff]  ;;  %p798_p10 = pnand %p797_p2, %p793_p8 }
  0x3b   : > { %308 = vmatpush.xpose.msra.mxu2 %v225_v9  ;;  %262 = vmatpush.xpose.msra.mxu0 %v223_v10  ;;  %v197_v38 = vld [vmem:[#allocation5 + $0x50] sm:$0xff]  ;;  %v195_v39 = vld [vmem:[#allocation5 + $0x40] sm:$0xff]  ;;  %v194_v41 = vld [vmem:[#allocation5 + $0x38] sm:$0xff] }
  0x3c   : > { %285 = vmatpush.xpose.msra.mxu1 %v224_v11  ;;  %v193_v40 = vld [vmem:[#allocation5 + $0x30] sm:$0xff]  ;;  %v192_v42 = vld [vmem:[#allocation5 + $0x28] sm:$0xff]  ;;  %v190_v43 = vld [vmem:[#allocation5 + $0x18] sm:$0xff] }
  0x3d   : > { %v191_v44 = vld [vmem:[#allocation5 + $0x20] sm:$0xff]  ;;  %v189_v45 = vld [vmem:[#allocation5 + $0x10] sm:$0xff]  ;;  %v188_v47 = vld [vmem:[#allocation5 + $0x8] sm:$0xff] }
  0x3e   : > { %v187_v46 = vld [vmem:[#allocation5] sm:$0xff]  ;;  %v182_v50 = vld [vmem:[%s970_s17 + $0x8] sm:$0xff]  ;;  %v184_v52 = vld [vmem:[%s970_s17 + $0x18] sm:$0xff] }
  0x3f   : > { %309 = vmatpush.xpose.msra.mxu2 %v222_v12  ;;  %263 = vmatpush.xpose.msra.mxu0 %v220_v13  ;;  %v981_v48 = vld [vmem:[%s970_s17 + $0x10] sm:$0xff]  ;;  %v181_v49 = vld [vmem:[%s970_s17] sm:$0xff]  ;;  %v987_v51 = vld [vmem:[%s970_s17 + $0x28] sm:$0xff] }
  0x40   : > { %286 = vmatpush.xpose.msra.mxu1 %v221_v14  ;;  %v185_v53 = vld [vmem:[%s970_s17 + $0x20] sm:$0xff]  ;;  %v256_v54 = vld [vmem:[#allocation5 + $0x228] sm:$0xff]  ;;  %v250_v56 = vld [vmem:[#allocation5 + $0x1f8] sm:$0xff] }
  0x41   : > { %336 = vmatpush.xpose.msra.mxu3 %v256_v54  ;;  %v253_v55 = vld [vmem:[#allocation5 + $0x210] sm:$0xff]  ;;  %v247_v59 = vld [vmem:[#allocation5 + $0x1e0] sm:$0xff]  ;;  %v244_v61 = vld [vmem:[#allocation5 + $0x1c8] sm:$0xff] }
  0x42   : > { %v241_v1 = vld [vmem:[#allocation5 + $0x1b0] sm:$0xff]  ;;  %v238_v4 = vld [vmem:[#allocation5 + $0x198] sm:$0xff]  ;;  %v235_v6 = vld [vmem:[#allocation5 + $0x180] sm:$0xff] }
  0x43   : > { %310 = vmatpush.xpose.msra.mxu2 %v219_v15  ;;  %264 = vmatpush.xpose.msra.mxu0 %v217_v16  ;;  %v258_v7 = vld [vmem:[#allocation5 + $0x238] sm:$0xff]  ;;  %v257_v8 = vld [vmem:[#allocation5 + $0x230] sm:$0xff]  ;;  %v251_v11 = vld [vmem:[#allocation5 + $0x200] sm:$0xff] }
  0x44   : > { %287 = vmatpush.xpose.msra.mxu1 %v218_v17  ;;  %v254_v10 = vld [vmem:[#allocation5 + $0x218] sm:$0xff]  ;;  %v248_v12 = vld [vmem:[#allocation5 + $0x1e8] sm:$0xff]  ;;  %v245_v13 = vld [vmem:[#allocation5 + $0x1d0] sm:$0xff] }
  0x45   : > { %337 = vmatpush.xpose.msra.mxu3 %v253_v55  ;;  %v242_v14 = vld [vmem:[#allocation5 + $0x1b8] sm:$0xff]  ;;  %v239_v15 = vld [vmem:[#allocation5 + $0x1a0] sm:$0xff]  ;;  %v236_v16 = vld [vmem:[#allocation5 + $0x188] sm:$0xff] }
  0x46   : > { %v255_v17 = vld [vmem:[#allocation5 + $0x220] sm:$0xff] }
  0x47   : > { %311 = vmatpush.xpose.msra.mxu2 %v216_v18  ;;  %265 = vmatpush.xpose.msra.mxu0 %v214_v19  ;;  %v252_v18 = vld [vmem:[#allocation5 + $0x208] sm:$0xff]  ;;  %v249_v19 = vld [vmem:[#allocation5 + $0x1f0] sm:$0xff] }
  0x48   : > { %288 = vmatpush.xpose.msra.mxu1 %v215_v20  ;;  %v246_v20 = vld [vmem:[#allocation5 + $0x1d8] sm:$0xff] }
  0x49   : > { %338 = vmatpush.xpose.msra.mxu3 %v250_v56 }
  0x4b   : > { %312 = vmatpush.xpose.msra.mxu2 %v213_v21  ;;  %266 = vmatpush.xpose.msra.mxu0 %v211_v22  ;;  %v243_v21 = vld [vmem:[#allocation5 + $0x1c0] sm:$0xff]  ;;  %v240_v22 = vld [vmem:[#allocation5 + $0x1a8] sm:$0xff] }
  0x4c   : > { %289 = vmatpush.xpose.msra.mxu1 %v212_v23  ;;  %v237_v23 = vld [vmem:[#allocation5 + $0x190] sm:$0xff] }
  0x4d   : > { %339 = vmatpush.xpose.msra.mxu3 %v247_v59 }
  0x4f   : > { %313 = vmatpush.xpose.msra.mxu2 %v210_v24  ;;  %267 = vmatpush.xpose.msra.mxu0 %v208_v25 }
  0x50   : > { %290 = vmatpush.xpose.msra.mxu1 %v209_v26 }
  0x51   : > { %340 = vmatpush.xpose.msra.mxu3 %v244_v61 }
  0x53   : > { %314 = vmatpush.xpose.msra.mxu2 %v207_v27  ;;  %268 = vmatpush.xpose.msra.mxu0 %v205_v28 }
  0x54   : > { %291 = vmatpush.xpose.msra.mxu1 %v206_v29 }
  0x55   : > { %341 = vmatpush.xpose.msra.mxu3 %v241_v1 }
  0x57   : > { %315 = vmatpush.xpose.msra.mxu2 %v204_v30  ;;  %269 = vmatpush.xpose.msra.mxu0 %v202_v31  ;;  %v435_v30 = vlaneseq }
  0x58   : > { %292 = vmatpush.xpose.msra.mxu1 %v203_v32 }
  0x59   : > { %342 = vmatpush.xpose.msra.mxu3 %v238_v4  ;;  %v436_v32 = vshrl.u32 %v435_v30, 7 }
  0x5b   : > { %316 = vmatpush.xpose.msra.mxu2 %v201_v33  ;;  %270 = vmatpush.xpose.msra.mxu0 %v199_v34  ;;  %v439_v33 = vand.u32 127, %v435_v30 }
  0x5c   : > { %293 = vmatpush.xpose.msra.mxu1 %v200_v35 }
  0x5d   : > { %343 = vmatpush.xpose.msra.mxu3 %v235_v6  ;;  %vm440_vm1 = vcmp.gt.s32.totalorder %v439_v33, %v436_v32 }
  0x5f   : > { %317 = vmatpush.xpose.msra.mxu2 %v198_v36  ;;  %271 = vmatpush.xpose.msra.mxu0 %v196_v37  ;;  %v437_v37 = vadd.s32 8, %v436_v32 }
  0x60   : > { %294 = vmatpush.xpose.msra.mxu1 %v197_v38  ;;  %344 = vmatmul.f32.vlgmr.msra.gmra.mxu3 %v181_v49 }
  0x61   : > { %359 = vmatpush.xpose.msrb.mxu3 %v257_v8  ;;  %vm441_vm2 = vcmp.gt.s32.totalorder %v439_v33, %v437_v37 }
  0x63   : > { %318 = vmatpush.xpose.msra.mxu2 %v195_v39  ;;  %272 = vmatpush.xpose.msra.mxu0 %v193_v40 }
  0x64   : > { %295 = vmatpush.xpose.msra.mxu1 %v194_v41 }
  0x65   : > { %360 = vmatpush.xpose.msrb.mxu3 %v254_v10 }
  0x67   : > { %319 = vmatpush.xpose.msra.mxu2 %v192_v42  ;;  %273 = vmatpush.xpose.msra.mxu0 %v190_v43 }
  0x68   : > { %296 = vmatpush.xpose.msra.mxu1 %v191_v44  ;;  %347 = vmatmul.f32.gmra.mxu3 %v184_v52 }
  0x69   : > { %361 = vmatpush.xpose.msrb.mxu3 %v251_v11 }
  0x6b   : > { %320 = vmatpush.xpose.msra.mxu2 %v189_v45  ;;  %274 = vmatpush.xpose.msra.mxu0 %v187_v46 }
  0x6c   : > { %297 = vmatpush.xpose.msra.mxu1 %v188_v47 }
  0x6d   : > { %362 = vmatpush.xpose.msrb.mxu3 %v248_v12 }
  0x6e   : > { %321 = vmatmul.f32.vlgmr.msra.gmra.mxu2 %v981_v48  ;;  %275 = vmatmul.f32.vlgmr.msra.gmra.mxu0 %v181_v49 }
  0x6f   : > { %298 = vmatmul.f32.vlgmr.msra.gmra.mxu1 %v182_v50  ;;  %382 = vmatpush.xpose.msrb.mxu0 %v258_v7 }
  0x71   : > { %363 = vmatpush.xpose.msrb.mxu3 %v245_v13 }
  0x73   : > { %383 = vmatpush.xpose.msrb.mxu0 %v255_v17 }
  0x75   : > { %364 = vmatpush.xpose.msrb.mxu3 %v242_v14 }
  0x76   : > { %324 = vmatmul.f32.gmra.mxu2 %v987_v51  ;;  %278 = vmatmul.f32.gmra.mxu0 %v184_v52 }
  0x77   : > { %301 = vmatmul.f32.gmra.mxu1 %v185_v53  ;;  %384 = vmatpush.xpose.msrb.mxu0 %v252_v18 }
  0x79   : > { %365 = vmatpush.xpose.msrb.mxu3 %v239_v15 }
  0x7b   : > { %385 = vmatpush.xpose.msrb.mxu0 %v249_v19 }
  0x7d   : > { %366 = vmatpush.xpose.msrb.mxu3 %v236_v16 }
  0x7f   : > { %386 = vmatpush.xpose.msrb.mxu0 %v246_v20 }
  0x80   : > { %367 = vmatmul.f32.vlgmr.msrb.gmra.mxu3 %v182_v50 }
  0x81   : > { %635 = vmatpush.xpose.msra.mxu3 %v258_v7 }
  0x83   : > { %387 = vmatpush.xpose.msrb.mxu0 %v243_v21 }
  0x85   : > { %636 = vmatpush.xpose.msra.mxu3 %v255_v17 }
  0x87   : > { %388 = vmatpush.xpose.msrb.mxu0 %v240_v22 }
  0x88   : > { %370 = vmatmul.f32.gmra.mxu3 %v185_v53 }
  0x89   : > { %637 = vmatpush.xpose.msra.mxu3 %v252_v18 }
  0x8b   : > { %389 = vmatpush.xpose.msrb.mxu0 %v237_v23 }
  0x8d   : > { %638 = vmatpush.xpose.msra.mxu3 %v249_v19 }
  0x8e   : > { %390 = vmatmul.f32.vlgmr.msrb.gmra.mxu0 %v981_v48 }
  0x91   : > { %639 = vmatpush.xpose.msra.mxu3 %v246_v20 }
  0x95   : > { %640 = vmatpush.xpose.msra.mxu3 %v243_v21 }
  0x99   : > { %641 = vmatpush.xpose.msra.mxu3 %v240_v22 }
  0x9d   : > { %642 = vmatpush.xpose.msra.mxu3 %v237_v23 }
  0xa0   : > { %393 = vmatmul.f32.vlgmr.msra.gmra.mxu3 %v987_v51 }
  0xe3   : > { %v345_v26 = vpop.f32.mrf.mxu3 }
  0xeb   : > { %v276_v57 = vpop.f32.mrf.mxu0  ;;  %v348_v27 = vpop.f32.mrf.mxu3 }
  0xec   : > { %v299_v58 = vpop.f32.mrf.mxu1 }
  0xed   : > { %v300_v5 = vadd.f32 %v299_v58, %v276_v57 }
  0xf1   : > { %v322_v60 = vpop.f32.mrf.mxu2 }
  0xf2   : > { %v323_v9 = vadd.f32 %v322_v60, %v300_v5 }
  0xf3   : > { %v279_v62 = vpop.f32.mrf.mxu0 }
  0xf4   : > { %v302_v63 = vpop.f32.mrf.mxu1 }
  0xf5   : > { %v303_v0 = vadd.f32 %v302_v63, %v279_v62 }
  0xf9   : > { %v325_v2 = vpop.f32.mrf.mxu2 }
  0xfa   : > { %v326_v3 = vadd.f32 %v325_v2, %v303_v0 }
  0xfc   : > { %401 = vrot.lane.b32.xlu0 %v326_v3, %s849_s15 }
 0x103   : > { %v368_v28 = vpop.f32.mrf.mxu3 }
 0x104   : > { %399 = vrot.lane.b32.xlu0 %v323_v9, %s849_s15  ;;  %v369_v34 = vadd.f32 %v368_v28, %v345_v26 }
 0x10b   : > { %v371_v29 = vpop.f32.mrf.mxu3  ;;  %v391_v39 = vpop.f32.mrf.mxu0 }
 0x10c   : > { %v372_v35 = vadd.f32 %v371_v29, %v348_v27  ;;  %v392_v40 = vadd.f32 %v391_v39, %v369_v34 }
 0x123   : > { %v394_v36 = vpop.f32.mrf.mxu3 }
 0x124   : > { %v395_v38 = vadd.f32 %v394_v36, %v372_v35 }
 0x126   : > { %505 = vmatpush.msrb.mxu2 %v395_v38 }
 0x128   : > { %506 = vmatpush.msrb.mxu2 %v392_v40 }
 0x16e   : > { %v402_v24 = vpop.permute.xlu0 %401 }
 0x16f   : > { %623 = vmatpush.xpose.msk.msrb.mxu1 %vm403_vm0, %v402_v24 }
 0x176   : > { %v400_v25 = vpop.permute.xlu0 %399 }
 0x177   : > { %624 = vmatpush.xpose.msk.msrb.mxu1 %vm403_vm0, %v400_v25 }
 0x17a   : > { %625 = vmatmul.msk.f32.vlgmr.msrb.gmra.mxu1 %vm403_vm0, %v323_v9 }
 0x182   : > { %626 = vmatmul.msk.f32.gmra.mxu1 %vm403_vm0, %v326_v3 }
 0x1f7   : > { %v429_v31 = vpop.f32.mrf.mxu1 }
 0x1f8   : > { %v442_v41 = vsel %vm440_vm1, -inf, %v429_v31 }
 0x1f9   : > { %v445_v44 = vsel %vm444_vm3, %v442_v41, -inf }
 0x1ff   : > { %v432_v42 = vpop.f32.mrf.mxu1 }
 0x200   : > { %v443_v43 = vsel %vm441_vm2, -inf, %v432_v42 }
 0x201   : > { %v446_v45 = vsel %vm444_vm3, %v443_v43, -inf }
 0x202   : > { %v447_v46 = vmax.f32 %v445_v44, %v446_v45 }
 0x204   : > { %v448_v47 = vrot.slane %v447_v46, 4 }
 0x206   : > { %v449_v48 = vmax.f32 %v447_v46, %v448_v47 }
 0x208   : > { %v450_v49 = vrot.slane %v449_v48, 2 }
 0x20a   : > { %v451_v50 = vmax.f32 %v449_v48, %v450_v49 }
 0x20c   : > { %v452_v51 = vrot.slane %v451_v50, 1 }
 0x20e   : > { %v453_v52 = vmax.f32 %v451_v50, %v452_v51 }
 0x210   : > { %v454_v53 = vsub.f32 %v442_v41, %v453_v52  ;;  %v455_v54 = vsub.f32 %v443_v43, %v453_v52 }
 0x212   : > { %v456_v55 = vmul.f32 1.442695, %v454_v53  ;;  %v458_v56 = vmul.f32 1.442695, %v455_v54 }
 0x214   : > { %708 = vpow2.f32 %v456_v55 }
 0x215   : > { %710 = vpow2.f32 %v458_v56 }
 0x21a   : > { %v709_v57 = vpop.eup %708 }
 0x21b   : > { %v711_v58 = vpop.eup %710  ;;  %v460_v59 = vsel %vm444_vm3, %v709_v57, 0.0 }
 0x21c   : > { %v461_v60 = vsel %vm444_vm3, %v711_v58, 0.0 }
 0x21d   : > { %v462_v61 = vadd.f32 %v461_v60, %v460_v59 }
 0x21f   : > { %v463_v62 = vrot.slane %v462_v61, 4 }
 0x221   : > { %v464_v63 = vadd.f32 %v463_v62, %v462_v61 }
 0x223   : > { %v465_v0 = vrot.slane %v464_v63, 2 }
 0x225   : > { %v466_v1 = vadd.f32 %v465_v0, %v464_v63 }
 0x227   : > { %v467_v2 = vrot.slane %v466_v1, 1 }
 0x229   : > { %v468_v3 = vadd.f32 %v467_v2, %v466_v1 }
 0x22b   : > { %712 = vrcp.f32 %v468_v3  ;;  %v480_v7 = vand.u32 2147483648, %v468_v3  ;;  %v478_v9 = vand.u32 2147483647, %v468_v3  ;;  %vm474_vm5 = vweird.f32 %v468_v3 }
 0x22d   : > { %v481_v11 = vor.u32 1.1754944e-38, %v480_v7  ;;  %vm479_vm7 = vcmp.eq.f32.partialorder %v478_v9, 8.507059e+37 }
 0x231   : > { %v713_v4 = vpop.eup %712 }
 0x232   : > { %v470_v5 = vmul.f32 %v713_v4, %v468_v3  ;;  %vm475_vm4 = vweird.f32 %v713_v4 }
 0x233   : > { %vm476_vm6 = vmor %vm474_vm5, %vm475_vm4 }
 0x234   : > { %v471_v6 = vsub.f32 1.0, %v470_v5 }
 0x236   : > { %v472_v8 = vmul.f32 %v713_v4, %v471_v6 }
 0x238   : > { %v473_v10 = vadd.f32 %v713_v4, %v472_v8 }
 0x23a   : > { %v477_v12 = vsel %vm476_vm6, %v713_v4, %v473_v10 }
 0x23b   : > { %v482_v13 = vsel %vm479_vm7, %v481_v11, %v477_v12 }
 0x23c   : > { %v483_v14 = vmul.f32 %v709_v57, %v482_v13  ;;  %v484_v15 = vmul.f32 %v711_v58, %v482_v13 }
 0x23e   : > { %627 = vmatmul.msk.f32.vlgmr.msrb.gmra.mxu2 %vm444_vm3, %v483_v14 }
 0x246   : > { %628 = vmatmul.msk.f32.gmra.mxu2 %vm444_vm3, %v484_v15 }
 0x2c1   : > { %v508_v16 = vpop.f32.mrf.mxu2 }
 0x2c2   : > { %514 = vst.msk [vmem:[%s180_s18] sm:$0xff] %vm403_vm0, %v508_v16 }
 0x2c9   : > { %v511_v17 = vpop.f32.mrf.mxu2 }
 0x2ca   : > { %515 = vst.msk [vmem:[%s180_s18 + $0x8] sm:$0xff] %vm403_vm0, %v511_v17 }
 0x2cb   : > { %801 = shalt.err (!%p798_p10)
}
 0x2cc   : > { %s850_s30 = smov 128   ;;  %s851_s7 = smov 8  }
 0x2cd   : > { %652 = dma.vmem_to_hbm [thread:$0]  (%p937_p7), %s530_s19, 256, %s532_s21, %s517_s22, %s850_s30, %s850_s30, %s851_s7  }
 0x2ce PF: > { %s546_s17 = sand.u32 1, %s832_s9   ;;  %p1048_p12 = scmp.ge.s32.totalorder %s844_s12, 2 }
 0x2cf   : > { %s547_s15 = scalar_lea.sflag [#allocation4], %s546_s17 }
 0x2d0   : > { %p663_p13 = pnand %p1048_p12, %p902_p6 }
 0x2d2   : > { %p664_p0 = pneg %p663_p13 }
 0x2d4   : > { %827 = dma.done.wait (%p664_p0), %s547_s15, 256  }
 0x2d5   : > { %829 = vsyncadd (%p664_p0), %s547_s15, 4294967040  ;;  %p16_p3 = scmp.ge.s32.totalorder %s920_s23, 4   ;;  %s1049_s9 = smov %s836_s10 }
 0x2d6   : > { %s1050_s10 = smov %s840_s11  ;;  %s1051_s11 = smov %s933_s28 }
 0x2d7   : > { %s1052_s12 = smov %s920_s23  ;;  %18 = sbr.rel (!%p16_p3) target bundleno = 6 (0x6), region = 77 }
 0x2dc   :  { %553 = vsyncpa [#allocation3], 1 }
 0x2dd   :  { %555 = vsyncpa [#allocation3 + $0x1], 1 }
 0x2de   :  { %556 = vsyncpa [#allocation6], 1 }
 0x2df   :  { %557 = vsyncpa [#allocation4], 1 }
 0x2e0   :  { %559 = vsyncpa [#allocation4 + $0x1], 1 }

</bundles_post_ra>
